<compile_context>
chip_gen: v6e
topology: v6e:2x2x1
jax: 0.10.0
libtpu: 0.0.40
codegen_flags: <defaults>
</compile_context>

<pallas_src>
import math
import jax
import jax.numpy as jnp
from jax import lax
from jax.experimental import pallas as pl
from jax.experimental.pallas import tpu as pltpu

_VMEM_LIMIT = 48 * 1024 * 1024  # stay well inside v7x's 64 MiB physical VMEM


# ---------------------------------------------------------------------------
# Kernel 1: 1x1 conv (channel matmul, NCHW-native) + folded-BN bias + ReLU
#   x block:   (1, Cin, tc)   -- H*W on lanes (lane-dense)
#   w block:   (Cout, Cin)    -- BN scale already folded in
#   b block:   (Cout, 1)
#   out block: (1, Cout, tc)
# ---------------------------------------------------------------------------
def _pw_kernel(x_ref, w_ref, b_ref, o_ref):
    acc = jnp.dot(w_ref[...], x_ref[0], preferred_element_type=jnp.float32)  # (Cout, tc)
    y = acc + b_ref[...]                                                     # bias broadcast
    o_ref[0] = jnp.maximum(y, 0.0).astype(o_ref.dtype)


def _pick_col_tile(hw, max_tile=2048):
    # Largest lane-dense tile: multiple of 128 if possible, else the full extent
    # (a full-extent block is always layout-legal). cdiv grid masks the last tile.
    if hw % 128 != 0:
        return hw
    return min(hw, max_tile)


def pointwise_bn_relu(x_flat, w_mat, bias, *, max_tile=2048):
    N, Cin, HW = x_flat.shape
    Cout = w_mat.shape[0]
    tc = _pick_col_tile(HW, max_tile)
    grid = (N, pl.cdiv(HW, tc))
    return pl.pallas_call(
        _pw_kernel,
        out_shape=jax.ShapeDtypeStruct((N, Cout, HW), x_flat.dtype),
        grid_spec=pltpu.PrefetchScalarGridSpec(
            num_scalar_prefetch=0,
            grid=grid,
            in_specs=[
                pl.BlockSpec((1, Cin, tc), lambda n, j: (n, 0, j)),
                pl.BlockSpec((Cout, Cin), lambda n, j: (0, 0)),
                pl.BlockSpec((Cout, 1), lambda n, j: (0, 0)),
            ],
            out_specs=pl.BlockSpec((1, Cout, tc), lambda n, j: (n, 0, j)),
        ),
        compiler_params=pltpu.CompilerParams(
            dimension_semantics=("parallel", "parallel"),
            vmem_limit_bytes=_VMEM_LIMIT,
        ),
    )(x_flat, w_mat, bias.reshape(Cout, 1))


# ---------------------------------------------------------------------------
# Kernel 2: depthwise/grouped 3x3 conv (pad=1, stride=1) + folded-BN bias + ReLU
#   Grid (N, H//th). Halo handled in-kernel: at h==0 the unpadded input image is
#   copied into a zero-filled (C, H+2, W+2) VMEM scratch that stays resident
#   across the h axis. Channel repeat (groups with rep outputs each) comes from
#   the (9, C, rep) weight layout; no repeated/padded tensors in HBM.
# ---------------------------------------------------------------------------
def _dw_kernel(x_ref, w_ref, b_ref, o_ref, pad_ref):
    h = pl.program_id(1)
    C, Hp2, Wp2 = pad_ref.shape
    H, W = Hp2 - 2, Wp2 - 2
    th = o_ref.shape[2]
    rep = w_ref.shape[2]

    @pl.when(h == 0)
    def _():
        pad_ref[...] = jnp.zeros_like(pad_ref)
        pad_ref[:, 1:H + 1, 1:W + 1] = x_ref[0].astype(pad_ref.dtype)

    row0 = h * th
    acc = jnp.zeros((C, rep, th, W), jnp.float32)
    for ky in range(3):
        rows = pad_ref[:, pl.ds(row0 + ky, th), :]                 # (C, th, W+2)
        for kx in range(3):
            tap = rows[:, :, kx:kx + W].astype(jnp.float32)        # (C, th, W)
            wt = w_ref[ky * 3 + kx]                                # (C, rep), BN-scale folded
            acc = acc + tap[:, None] * wt[:, :, None, None]
    y = acc + b_ref[...][:, :, None, None]
    o_ref[0] = jnp.maximum(y, 0.0).reshape(C * rep, th, W).astype(o_ref.dtype)


def _pick_h_tile(H, cap=32):
    # Largest th <= cap with th % 8 == 0 (layout-legal output block) that divides H;
    # otherwise fall back to the full height (always legal).
    for th in range(min(cap, H), 7, -1):
        if th % 8 == 0 and H % th == 0:
            return th
    return H


def depthwise3x3_bn_relu(x1, w9, bias):
    N, C, H, W = x1.shape
    _, _, rep = w9.shape
    new_ch = C * rep
    th = _pick_h_tile(H)
    grid = (N, H // th)
    return pl.pallas_call(
        _dw_kernel,
        out_shape=jax.ShapeDtypeStruct((N, new_ch, H, W), x1.dtype),
        grid_spec=pltpu.PrefetchScalarGridSpec(
            num_scalar_prefetch=0,
            grid=grid,
            in_specs=[
                pl.BlockSpec((1, C, H, W), lambda n, h: (n, 0, 0, 0)),  # resident across h
                pl.BlockSpec((9, C, rep), lambda n, h: (0, 0, 0)),
                pl.BlockSpec((C, rep), lambda n, h: (0, 0)),
            ],
            out_specs=pl.BlockSpec((1, new_ch, th, W), lambda n, h: (n, 0, h, 0)),
            scratch_shapes=[pltpu.VMEM((C, H + 2, W + 2), x1.dtype)],
        ),
        compiler_params=pltpu.CompilerParams(
            dimension_semantics=("parallel", "arbitrary"),
            vmem_limit_bytes=_VMEM_LIMIT,
        ),
    )(x1, w9, bias)


# ---------------------------------------------------------------------------
# Parameter init (deterministic, matching PyTorch __init__ shapes)
# ---------------------------------------------------------------------------
def init_params(key, inp, oup, ratio=2, dw_size=3):
    init_ch = math.ceil(oup / ratio)
    new_ch = init_ch * (ratio - 1)
    ks = jax.random.split(key, 10)
    return {
        # nn.Conv2d(inp, init_ch, 1, bias=False) -> (O, I, 1, 1)
        "w_pw": 0.1 * jax.random.normal(ks[0], (init_ch, inp, 1, 1), jnp.float32),
        # nn.Conv2d(init_ch, new_ch, 3, groups=init_ch, bias=False) -> (O, 1, 3, 3)
        "w_dw": 0.1 * jax.random.normal(ks[1], (new_ch, 1, dw_size, dw_size), jnp.float32),
        # BatchNorm2d(init_ch) eval-mode params
        "g1": 1.0 + 0.1 * jax.random.normal(ks[2], (init_ch,), jnp.float32),
        "b1": 0.1 * jax.random.normal(ks[3], (init_ch,), jnp.float32),
        "m1": 0.1 * jax.random.normal(ks[4], (init_ch,), jnp.float32),
        "v1": jnp.abs(jax.random.normal(ks[5], (init_ch,), jnp.float32)) + 0.5,
        # BatchNorm2d(new_ch) eval-mode params
        "g2": 1.0 + 0.1 * jax.random.normal(ks[6], (new_ch,), jnp.float32),
        "b2": 0.1 * jax.random.normal(ks[7], (new_ch,), jnp.float32),
        "m2": 0.1 * jax.random.normal(ks[8], (new_ch,), jnp.float32),
        "v2": jnp.abs(jax.random.normal(ks[9], (new_ch,), jnp.float32)) + 0.5,
    }


def _fold_bn(gamma, beta, mean, var, eps=1e-5):
    scale = gamma / jnp.sqrt(var + eps)
    bias = beta - mean * scale
    return scale, bias


# ---------------------------------------------------------------------------
# Forward (wrapper): NCHW in -> [x1 (NCHW), x2 (NCHW)] out, like the module.
# ---------------------------------------------------------------------------
def ghost_feat_forward(x_nchw, p):
    s1, bb1 = _fold_bn(p["g1"], p["b1"], p["m1"], p["v1"])
    s2, bb2 = _fold_bn(p["g2"], p["b2"], p["m2"], p["v2"])

    init_ch = p["w_pw"].shape[0]
    new_ch = p["w_dw"].shape[0]
    rep = new_ch // init_ch

    N, Cin, H, W = x_nchw.shape
    HW = H * W

    # primary_conv: 1x1 conv == channel matmul, NCHW-native (no transposes).
    # BN scale folded into the weight; kernel adds only the bias.
    w_pw = p["w_pw"][:, :, 0, 0] * s1[:, None]                     # (init_ch, Cin)
    x_flat = x_nchw.reshape(N, Cin, HW)
    x1 = pointwise_bn_relu(x_flat, w_pw, bb1).reshape(N, init_ch, H, W)

    # cheap_operation: grouped 3x3 conv (groups=init_ch, rep outputs per group).
    # PyTorch output channel o = g*rep + r uses input channel g and weight w_dw[o];
    # encode that as weights (9, init_ch, rep) with BN scale folded in.
    w_dw = p["w_dw"][:, 0].reshape(init_ch, rep, 3, 3) \
        * s2.reshape(init_ch, rep)[:, :, None, None]
    w9 = jnp.transpose(w_dw, (2, 3, 0, 1)).reshape(9, init_ch, rep)
    b2 = bb2.reshape(init_ch, rep)
    x2 = depthwise3x3_bn_relu(x1, w9, b2)

    return x1, x2


# ---------------------------------------------------------------------------
# Pure-JAX reference (NCHW, matching PyTorch conv/BN(eval)/ReLU semantics)
# ---------------------------------------------------------------------------
def ghost_feat_reference(x_nchw, p):
    s1, bb1 = _fold_bn(p["g1"], p["b1"], p["m1"], p["v1"])
    s2, bb2 = _fold_bn(p["g2"], p["b2"], p["m2"], p["v2"])
    init_ch = p["w_pw"].shape[0]

    x1 = lax.conv_general_dilated(
        x_nchw, p["w_pw"], window_strides=(1, 1), padding="VALID",
        dimension_numbers=("NCHW", "OIHW", "NCHW"))
    x1 = jnp.maximum(x1 * s1[None, :, None, None] + bb1[None, :, None, None], 0.0)

    x2 = lax.conv_general_dilated(
        x1, p["w_dw"], window_strides=(1, 1), padding=((1, 1), (1, 1)),
        feature_group_count=init_ch,
        dimension_numbers=("NCHW", "OIHW", "NCHW"))
    x2 = jnp.maximum(x2 * s2[None, :, None, None] + bb2[None, :, None, None], 0.0)
    return x1, x2


if __name__ == "__main__":
    key = jax.random.PRNGKey(0)
    k_x, k_p, k_x2, k_p2 = jax.random.split(key, 4)

    # Case 1: batch=2, inp=4, 16x16, oup=8 (ratio=2 -> init_ch=4, rep=1)
    N, INP, H, W, OUP = 2, 4, 16, 16, 8
    x = jax.random.normal(k_x, (N, INP, H, W), jnp.float32)
    params = init_params(k_p, INP, OUP, ratio=2)

    x1, x2 = ghost_feat_forward(x, params)
    jax.block_until_ready(x1)
    jax.block_until_ready(x2)

    r1, r2 = ghost_feat_reference(x, params)
    assert x1.shape == r1.shape and x2.shape == r2.shape
    assert jnp.allclose(x1, r1, atol=1e-4, rtol=1e-4), "primary_conv mismatch (case 1)"
    assert jnp.allclose(x2, r2, atol=1e-4, rtol=1e-4), "cheap_operation mismatch (case 1)"

    # Case 2: exercises ratio>2 (rep=2), multi-tile H (th=24 over H=48), and HW % 128 != 0.
    N2, INP2, H2, W2, OUP2 = 1, 5, 48, 20, 9   # init_ch=3, new_ch=6, rep=2
    x_b = jax.random.normal(k_x2, (N2, INP2, H2, W2), jnp.float32)
    params_b = init_params(k_p2, INP2, OUP2, ratio=3)

    y1, y2 = ghost_feat_forward(x_b, params_b)
    jax.block_until_ready(y1)
    jax.block_until_ready(y2)

    q1, q2 = ghost_feat_reference(x_b, params_b)
    assert y1.shape == q1.shape and y2.shape == q2.shape
    assert jnp.allclose(y1, q1, atol=1e-4, rtol=1e-4), "primary_conv mismatch (case 2)"
    assert jnp.allclose(y2, q2, atol=1e-4, rtol=1e-4), "cheap_operation mismatch (case 2)"

    print("KERNEL_OK")
</pallas_src>

<mosaic_0001>
module attributes {stable_mosaic.version = 11 : i64} {
  func.func @_pw_kernel(%arg0: i32, %arg1: i32, %arg2: memref<1x4x256xf32, #tpu.memory_space<vmem>>, %arg3: memref<4x4xf32, #tpu.memory_space<vmem>>, %arg4: memref<4x1xf32, #tpu.memory_space<vmem>>, %arg5: memref<1x4x256xf32, #tpu.memory_space<vmem>>) attributes {dimension_semantics = [#tpu.dimension_semantics<parallel>, #tpu.dimension_semantics<parallel>], iteration_bounds = array<i64: 2, 1>, scalar_prefetch = 0 : i64, scratch_operands = 0 : i64, tpu.core_type = #tpu.core_type<tc>, window_params = [{transform_indices = @transform_0, window_bounds = array<i64: 1, 4, 256>}, {pipeline_mode = #tpu.pipeline_mode<synchronous>, transform_indices = @transform_1, window_bounds = array<i64: 4, 4>}, {pipeline_mode = #tpu.pipeline_mode<synchronous>, transform_indices = @transform_2, window_bounds = array<i64: 4, 1>}, {transform_indices = @transform_3, window_bounds = array<i64: 1, 4, 256>}]} {
    %c0 = arith.constant 0 : index
    %c0_0 = arith.constant 0 : index
    %0 = vector.load %arg3[%c0, %c0_0] : memref<4x4xf32, #tpu.memory_space<vmem>>, vector<4x4xf32>
    %c0_1 = arith.constant 0 : index
    %c0_2 = arith.constant 0 : index
    %c0_3 = arith.constant 0 : index
    %1 = vector.load %arg2[%c0_1, %c0_2, %c0_3] : memref<1x4x256xf32, #tpu.memory_space<vmem>>, vector<1x4x256xf32>
    %2 = vector.shape_cast %1 : vector<1x4x256xf32> to vector<4x256xf32>
    %cst = arith.constant dense<0.000000e+00> : vector<4x256xf32>
    %3 = tpu.matmul %0, %2, %cst {dimension_numbers = #tpu.dot_dimension_numbers<[1], [0], [0], [1], [0, 0, 1, 1], [], []>} : vector<4x4xf32>, vector<4x256xf32>, vector<4x256xf32> -> vector<4x256xf32>
    %c0_4 = arith.constant 0 : index
    %c0_5 = arith.constant 0 : index
    %4 = vector.load %arg4[%c0_4, %c0_5] : memref<4x1xf32, #tpu.memory_space<vmem>>, vector<4x1xf32>
    %5 = vector.broadcast %4 : vector<4x1xf32> to vector<4x256xf32>
    %6 = arith.addf %3, %5 : vector<4x256xf32>
    %cst_6 = arith.constant 0.000000e+00 : f32
    %7 = vector.broadcast %cst_6 : f32 to vector<4x256xf32>
    %8 = arith.maximumf %6, %7 : vector<4x256xf32>
    %c0_7 = arith.constant 0 : index
    %c0_8 = arith.constant 0 : index
    %c0_9 = arith.constant 0 : index
    %9 = vector.load %arg5[%c0_7, %c0_8, %c0_9] : memref<1x4x256xf32, #tpu.memory_space<vmem>>, vector<1x4x256xf32>
    %10 = vector.shape_cast %9 : vector<1x4x256xf32> to vector<4x256xf32>
    %11 = vector.shape_cast %8 : vector<4x256xf32> to vector<1x4x256xf32>
    tpu.vector_store %arg5[%c0_7, %c0_8, %c0_9], %11 {strides = array<i32>} : memref<1x4x256xf32, #tpu.memory_space<vmem>>, vector<1x4x256xf32>,
    return
  }
  func.func @transform_0(%arg0: i32, %arg1: i32) -> (i32, i32, i32) {
    %c0_i32 = arith.constant 0 : i32
    %c0_i32_0 = arith.constant 0 : i32
    return %arg0, %c0_i32, %arg1 : i32, i32, i32
  }
  func.func @transform_1(%arg0: i32, %arg1: i32) -> (i32, i32) {
    %c0_i32 = arith.constant 0 : i32
    %c0_i32_0 = arith.constant 0 : i32
    %c0_i32_1 = arith.constant 0 : i32
    return %c0_i32, %c0_i32_0 : i32, i32
  }
  func.func @transform_2(%arg0: i32, %arg1: i32) -> (i32, i32) {
    %c0_i32 = arith.constant 0 : i32
    %c0_i32_0 = arith.constant 0 : i32
    %c0_i32_1 = arith.constant 0 : i32
    return %c0_i32, %c0_i32_0 : i32, i32
  }
  func.func @transform_3(%arg0: i32, %arg1: i32) -> (i32, i32, i32) {
    %c0_i32 = arith.constant 0 : i32
    %c0_i32_0 = arith.constant 0 : i32
    return %arg0, %c0_i32, %arg1 : i32, i32, i32
  }
}

</mosaic_0001>

<bundles_post_ra>
// kernel: tpu_custom_call.1
= control target key start
LH: loop header
LB: loop body
LE: loop exit
PB: predicated region body
PF: predicated region fallthrough
CT: control target
= control target key end

     0   :  { %8 = vsyncpa [#allocation3], 0  ;;  %s765_s0 = inlined_call_operand.hbm [shape: f32[2,4,256], index: 0, kind: input, shape index: {}]   ;;  %s766_s1 = inlined_call_operand.vmem [shape: f32[4,4], index: 1, kind: input, shape index: {}]   ;;  %s767_s2 = inlined_call_operand.vmem [shape: f32[4,1], index: 2, kind: input, shape index: {}]   ;;  %s768_s3 = inlined_call_operand.hbm [shape: f32[2,4,256], index: 3, kind: output, shape index: {}]  }
   0x1   :  { %10 = vsyncpa [#allocation3 + $0x1], 0 }
   0x2   :  { %11 = vsyncpa [#allocation4], 0 }
   0x3   :  { %13 = vsyncpa [#allocation4 + $0x1], 0  ;;  %s625_s12 = smov 0   ;;  %s627_s13 = smov 0  }
   0x4   :  { %s629_s14 = smov 0   ;;  %s631_s15 = smov 0  }
   0x5   :  { %s633_s16 = smov 0   ;;  %s635_s17 = smov 0  }
   0x6 LB: > { %s405_s18 = sadd.s32 4294967295, %s599_s17   ;;  %s406_s19 = sadd.s32 4294967294, %s599_s17   ;;  %s599_s17 = sphi %s635_s17, %s19_s17   ;;  %s595_s16 = sphi %s633_s16, %s780_s16   ;;  %s591_s15 = sphi %s631_s15, %s779_s15   ;;  %s587_s14 = sphi %s629_s14, %s778_s14   ;;  %s583_s13 = sphi %s627_s13, %s777_s13   ;;  %s579_s12 = sphi %s625_s12, %s776_s12  }
   0x7   : > { %s31_s20 = sadd.s32 1, %s595_s16  ;;  %s40_s21 = sadd.s32 1, %s587_s14 }
   0x8   : > { %p33_p0 = scmp.ge.s32.totalorder %s31_s20, 2  ;;  %p47_p1 = scmp.ne.s32.totalorder %s587_s14, %s583_s13 }
   0x9   : > { %p48_p2 = scmp.eq.s32.totalorder %s599_s17, 0  ;;  %p53_p3 = scmp.ne.s32.totalorder %s583_s13, %s579_s12 }
   0xa   : > { %s782_s20 = smov (%p33_p0, %s31_s20), 0  ;;  %p54_p5 = scmp.eq.s32.totalorder %s405_s18, 0 }
   0xb   : > { %p666_p4 = por %p48_p2, %p47_p1  ;;  %s35_s23 = ssub.s32 %s595_s16, %s782_s20 }
   0xc   : > { %p121_p6 = scmp.eq.s32.totalorder %s405_s18, 1  ;;  %p38_p7 = scmp.eq.s32.totalorder %s35_s23, 0 }
   0xd   : > { %p672_p8 = por %p54_p5, %p53_p3  ;;  %p127_p10 = scmp.eq.s32.totalorder %s406_s19, 1 }
   0xe   : > { %p676_p9 = por %p121_p6, %p47_p1  ;;  %p437_p13 = scmp.lt.s32.totalorder %s599_s17, 2 }
   0xf   : > { %s681_s26 = scalar_select %p38_p7, %s587_s14, %s40_s21  }
  0x10   : > { %p683_p11 = por %p127_p10, %p53_p3  ;;  %s153_s28 = sand.u32 1, %s587_s14  }
  0x11   : > { %s409_s29 = sshll.u32 %s153_s28, 3  ;;  %s423_s30 = sshll.u32 %s595_s16, 7 }
  0x12   : > { %s772_s27 = scalar_select %p683_p11, 1, 0 }
  0x13   : > { %s165_s6 = scalar_lea.hbm %s765_s0, %s423_s30  ;;  %s157_s7 = scalar_lea.vmem [#allocation2], %s409_s29 }
  0x14   : > { %s167_s8 = sshll.u32 %s157_s7, 4  ;;  %p696_p0 = pnand %p437_p13, %p666_p4  ;;  %s168_s8 = int_to_ptr.vmem [resolvable:$true] %s167_s8 }
  0x15   : > { %p412_p1 = scmp.ge.s32.totalorder %s599_s17, 1  ;;  %p172_p2 = scmp.lt.s32.totalorder %s599_s17, 3 }
  0x16   : > { %s154_s10 = scalar_lea.sflag [#allocation3], %s153_s28  ;;  %p493_p3 = pneg %p696_p0 }
  0x17   : > { %s504_s11 = scalar_lea.vmem %s168_s8, 128  ;;  %s601_s18 = smov [#allocation2]  }
  0x18   : > { %p505_p5 = scmp.ne.s32.totalorder %s168_s8, %s504_s11  ;;  %s509_s19 = sshll.u32 %s601_s18, 4  ;;  %s510_s19 = int_to_ptr.vmem [resolvable:$false] %s509_s19 }
  0x19   : > { %s511_s21 = scalar_lea.vmem %s510_s19, 256  ;;  %p512_p10 = scmp.lt.s32.totalorder %s168_s8, %s510_s19 }
  0x1a   : > { %p507_p6 = pnand %p505_p5, %p493_p3  ;;  %p513_p12 = scmp.lt.s32.totalorder %s511_s21, %s504_s11 }
  0x1c   : > { %p508_p7 = pneg %p507_p6  ;;  %p514_p4 = por %p513_p12, %p512_p10 }
  0x1e   : > { %p515_p13 = pnand %p514_p4, %p508_p7 }
  0x20   : > { %518 = shalt.err (!%p515_p13)
}
  0x21   : > { %432 = dma.hbm_to_vmem [thread:$0]  (!%p696_p0), %s165_s6, 128, %s168_s8, %s154_s10  }
  0x22   : > { %p173_p11 = pnand %p412_p1, %p172_p2 }
  0x23   : > { %s711_s22 = sand.u32 (!%p173_p11), 1, %s583_s13  }
  0x24   : > { %176 = sbr.rel (%p173_p11) target bundleno = 261 (0x105), region = 32  ;;  %s413_s23 = sshll.u32 (!%p173_p11), %s711_s22, 3 }
  0x25   : > { %s179_s28 = scalar_lea.sflag (!%p173_p11), [#allocation3], %s711_s22  ;;  %s182_s29 = scalar_lea.vmem (!%p173_p11), [#allocation2], %s413_s23 }
  0x29   : > { %570 = dma.done.wait (%p672_p8), %s179_s28, 128  }
  0x2a   : > { %572 = vsyncadd (%p672_p8), %s179_s28, 4294967168  ;;  %v602_v0 = vmov 0.0   ;;  %v603_v1 = vmov 0   ;;  %v208_v2 = vld [vmem:[%s182_s29] sm:$0xff]  ;;  %vm221_vm0 = vcmask 1043456   ;;  %vm217_vm1 = vcmask 31744  }
  0x2b   : > { %290 = vmatprep.mubr.f32.mxu0 %v602_v0  ;;  %489 = vset.pattern.permute.xlu0 %v603_v1  ;;  %v209_v3 = vld [vmem:[%s767_s2] sm:$0xf]  ;;  %v216_v4 = vcombine.high %v208_v2, %v208_v2  ;;  %s424_s24 = sshll.u32 %s591_s15, 7  ;;  %s204_s7 = scalar_lea.vmem [#allocation5], %s413_s23 }
  0x2c   : > { %212 = vperm.xlu0 %489, %v209_v3   ;;  %v207_v5 = vld [vmem:[%s766_s1] sm:$0xf]  ;;  %s321_s8 = sshll.u32 %s204_s7, 4  ;;  %s319_s11 = scalar_lea.hbm %s768_s3, %s424_s24  ;;  %s322_s8 = int_to_ptr.vmem [resolvable:$true] %s321_s8 }
  0x2d   : > { %415 = vmatprep.subr.msk.mxu0 %vm221_vm0, %v216_v4  ;;  %s305_s18 = scalar_lea.sflag [#allocation4], %s711_s22  ;;  %s519_s19 = scalar_lea.vmem %s322_s8, 128 }
  0x2e   : > { %416 = vmatpush1.msk.msra.mxu0 %vm221_vm0, %v208_v2  ;;  %p520_p8 = scmp.ne.s32.totalorder %s322_s8, %s519_s19  ;;  %s604_s21 = smov [#allocation5]  }
  0x2f   : > { %417 = vmatmul.mubr.msk.f32.vlgmr.msra.gmra.mxu0 %vm217_vm1, %v207_v5  ;;  %s523_s28 = sshll.u32 %s604_s21, 4  ;;  %s524_s28 = int_to_ptr.vmem [resolvable:$false] %s523_s28 }
  0x30   : > { %p521_p11 = pnand %p520_p8, %p676_p9  ;;  %s525_s15 = scalar_lea.vmem %s524_s28, 256 }
  0x31   : > { %p526_p0 = scmp.lt.s32.totalorder %s322_s8, %s524_s28  ;;  %p527_p1 = scmp.lt.s32.totalorder %s525_s15, %s519_s19 }
  0x32   : > { %p522_p12 = pneg %p521_p11 }
  0x33   : > { %p528_p2 = por %p527_p1, %p526_p0 }
  0x35   : > { %p529_p3 = pnand %p528_p2, %p522_p12 }
  0xa7   : > { %v213_v6 = vpop.permute.xlu0 %212 }
  0xef   : > { %v292_v7 = vpop.f32.mrf.mxu0 }
  0xf0   : > { %v293_v8 = vadd.f32 %v292_v7, %v213_v6 }
  0xf1   : > { %v294_v9 = vpop.f32.mrf.mxu0 }
  0xf2   : > { %v295_v10 = vadd.f32 %v294_v9, %v213_v6  ;;  %v297_v11 = vmax.f32 %v293_v8, 0.0 }
  0xf4   : > { %v298_v12 = vmax.f32 %v295_v10, 0.0 }
  0xf6   : > { %v301_v13 = vcombine.low %v297_v11, %v298_v12 }
  0xf8   : > { %303 = vst [vmem:[%s204_s7] sm:$0xff] %v301_v13 }
  0xf9   : > { %532 = shalt.err (!%p529_p3)
}
  0xfa   : > { %s533_s23 = scalar_lea.hbm %s319_s11, 128  ;;  %s537_s30 = scalar_lea.hbm %s768_s3, 256 }
  0xfb   : > { %p534_p5 = scmp.ne.s32.totalorder %s319_s11, %s533_s23  ;;  %p538_p10 = scmp.lt.s32.totalorder %s319_s11, %s768_s3 }
  0xfc   : > { %p539_p4 = scmp.lt.s32.totalorder %s537_s30, %s533_s23 }
  0xfd   : > { %p535_p6 = pnand %p534_p5, %p676_p9 }
  0xfe   : > { %p540_p13 = por %p539_p4, %p538_p10 }
  0xff   : > { %p536_p7 = pneg %p535_p6 }
 0x101   : > { %p541_p8 = pnand %p540_p13, %p536_p7 }
 0x103   : > { %544 = shalt.err (!%p541_p8)
}
 0x104   : > { %427 = dma.vmem_to_hbm [thread:$0]  (%p676_p9), %s322_s8, 128, %s319_s11, %s305_s18  }
 0x105 PF: > { %s333_s6 = sand.u32 1, %s579_s12   ;;  %p774_p11 = scmp.ne.s32.totalorder %s772_s27, 0 }
 0x106   : > { %p775_p12 = scmp.ge.s32.totalorder %s599_s17, 2  ;;  %s334_s24 = scalar_lea.sflag [#allocation4], %s333_s6 }
 0x108   : > { %p434_p0 = pnand %p775_p12, %p774_p11 }
 0x10a   : > { %p435_p1 = pneg %p434_p0 }
 0x10c   : > { %574 = dma.done.wait (%p435_p1), %s334_s24, 128  }
 0x10d   : > { %576 = vsyncadd (%p435_p1), %s334_s24, 4294967168  ;;  %s19_s17 = sadd.s32 1, %s599_s17   ;;  %s776_s12 = smov %s583_s13 }
 0x10e   : > { %p16_p2 = scmp.ge.s32.totalorder %s19_s17, 4   ;;  %s777_s13 = smov %s587_s14 }
 0x10f   : > { %s778_s14 = smov %s681_s26  ;;  %s779_s15 = smov %s595_s16 }
 0x110   : > { %s780_s16 = smov %s782_s20  ;;  %18 = sbr.rel (!%p16_p2) target bundleno = 6 (0x6), region = 77 }
 0x115   :  { %339 = vsyncpa [#allocation3], 1 }
 0x116   :  { %341 = vsyncpa [#allocation3 + $0x1], 1 }
 0x117   :  { %342 = vsyncpa [#allocation4], 1 }
 0x118   :  { %344 = vsyncpa [#allocation4 + $0x1], 1 }

</bundles_post_ra>
